<compile_context>
chip_gen: v5e
topology: v5e:2x2
jax: 0.10.0
libtpu: 0.0.40
codegen_flags: <defaults>
</compile_context>

<pallas_src>
import functools

import jax
import jax.numpy as jnp
from jax import lax
from jax.experimental import pallas as pl
from jax.experimental.pallas import tpu as pltpu


LEAKY_SLOPE = 0.2
NEG_INF = -1e30


def _leaky_relu(x):
    return jnp.where(x >= 0.0, x, LEAKY_SLOPE * x)


# --------------------------- kernel 1: single GATConv layer ---------------------------

def gat_layer_kernel(x_ref, w_ref, att_src_ref, att_dst_ref, bias_ref, cedge_ref,
                     adj_ref, eattr_ref, out_ref,
                     h_bf_ref, asrc_ref, adst_ref, *, block_dst, apply_relu):
    i = pl.program_id(0)

    @pl.when(i == 0)
    def _project():
        # h = x @ W and the per-node attention logits; persisted in scratch for all dst tiles.
        h = jnp.dot(x_ref[...].astype(jnp.float32), w_ref[...].astype(jnp.float32),
                    preferred_element_type=jnp.float32)                       # (N, F)
        h_bf_ref[...] = h.astype(jnp.bfloat16)
        asrc_ref[...] = lax.dot_general(att_src_ref[...], h, (((1,), (1,)), ((), ())),
                                        preferred_element_type=jnp.float32)   # (1, N)
        adst_ref[...] = lax.dot_general(h, att_dst_ref[...], (((1,), (1,)), ((), ())),
                                        preferred_element_type=jnp.float32)   # (N, 1)

    start = pl.multiple_of(i * block_dst, block_dst)
    a_dst = adst_ref[pl.ds(start, block_dst), :]          # (T, 1)
    a_src = asrc_ref[...]                                 # (1, N)
    c_edge = cedge_ref[0]

    # score[i, j] = a_src[j] + a_dst[i] + c_edge * eattr[i, j]
    scores = a_dst + a_src + c_edge * eattr_ref[...].astype(jnp.float32)      # (T, N)
    scores = _leaky_relu(scores)
    scores = jnp.where(adj_ref[...] > 0, scores, NEG_INF)  # single mask; exp underflows to 0

    m = jnp.max(scores, axis=1, keepdims=True)
    p = jnp.exp(scores - m)
    inv_denom = pl.reciprocal(jnp.sum(p, axis=1, keepdims=True), approx=True)

    out = jnp.dot(p.astype(jnp.bfloat16), h_bf_ref[...],
                  preferred_element_type=jnp.float32) * inv_denom + bias_ref[...]
    if apply_relu:
        out = jnp.maximum(out, 0.0)
    out_ref[...] = out.astype(out_ref.dtype)


# ------------------- kernel 2: fused conv_mu (+edge attr) / conv_logstd -------------------

def gat_dual_kernel(x_ref, w_ref, att_src_ref, att_dst_ref, bias_ref, cedge_ref,
                    adj_ref, eattr_ref, mu_ref, ls_ref,
                    h_bf_ref, asrc_ref, adst_ref, *, block_dst, f_out_p):
    i = pl.program_id(0)

    @pl.when(i == 0)
    def _project():
        # W is the column-wise concat [W_mu | W_logstd]; att matrices are block-diagonal so a
        # single dot produces both layers' logits.
        h = jnp.dot(x_ref[...].astype(jnp.float32), w_ref[...].astype(jnp.float32),
                    preferred_element_type=jnp.float32)                       # (N, 2F)
        h_bf_ref[...] = h.astype(jnp.bfloat16)
        asrc_ref[...] = lax.dot_general(att_src_ref[...], h, (((1,), (1,)), ((), ())),
                                        preferred_element_type=jnp.float32)   # (2, N)
        adst_ref[...] = lax.dot_general(h, att_dst_ref[...], (((1,), (1,)), ((), ())),
                                        preferred_element_type=jnp.float32)   # (N, 2)

    start = pl.multiple_of(i * block_dst, block_dst)
    adj = adj_ref[...]                                    # (T, N) bf16, loaded once, shared
    a_src_all = asrc_ref[...]                             # (2, N)
    a_dst_all = adst_ref[pl.ds(start, block_dst), :]      # (T, 2)
    bias_all = bias_ref[...]                              # (2, F)
    h_bf = h_bf_ref[...]                                  # (N, 2F)
    c_edge = cedge_ref[0]

    def attend(a_dst_col, a_src_row, edge_term, h_half, bias_row, o_ref):
        scores = a_dst_col + a_src_row
        if edge_term is not None:
            scores = scores + edge_term
        scores = _leaky_relu(scores)
        scores = jnp.where(adj > 0, scores, NEG_INF)
        m = jnp.max(scores, axis=1, keepdims=True)
        p = jnp.exp(scores - m)
        inv = pl.reciprocal(jnp.sum(p, axis=1, keepdims=True), approx=True)
        out = jnp.dot(p.astype(jnp.bfloat16), h_half,
                      preferred_element_type=jnp.float32) * inv + bias_row
        o_ref[...] = out.astype(o_ref.dtype)

    # conv_mu: uses the edge attributes.
    attend(a_dst_all[:, 0:1], a_src_all[0:1, :],
           c_edge * eattr_ref[...].astype(jnp.float32),
           h_bf[:, :f_out_p], bias_all[0:1, :], mu_ref)
    # conv_logstd: called WITHOUT edge_attr in the reference forward.
    attend(a_dst_all[:, 1:2], a_src_all[1:2, :],
           None,
           h_bf[:, f_out_p:], bias_all[1:2, :], ls_ref)


# --------------------------------- wrappers ---------------------------------

def _round_up(v, m):
    return (v + m - 1) // m * m


def _pad2(a, rows, cols):
    return jnp.pad(a, ((0, rows - a.shape[0]), (0, cols - a.shape[1])))


_VMEM_LIMIT = 64 * 1024 * 1024  # explicit budget; fits v7x's 64 MiB physical VMEM


def gat_layer(x, params, adj, eattr, *, block_dst, apply_relu=True):
    """One GATConv layer. x: (N_p, F_in) padded; returns (N_p, F_out_p) with zero padded cols."""
    n_p, f_in = x.shape
    assert n_p % block_dst == 0 and block_dst % 8 == 0
    f_out = params["w"].shape[1]
    f_out_p = _round_up(f_out, 128)

    w = _pad2(params["w"].astype(jnp.float32), f_in, f_out_p)
    att_src = _pad2(params["att_src"], 1, f_out_p)
    att_dst = _pad2(params["att_dst"], 1, f_out_p)
    bias = _pad2(params["bias"], 1, f_out_p)
    c_edge = jnp.asarray(params["c_edge"], jnp.float32).reshape(1)

    kernel = functools.partial(gat_layer_kernel, block_dst=block_dst, apply_relu=apply_relu)
    return pl.pallas_call(
        kernel,
        out_shape=jax.ShapeDtypeStruct((n_p, f_out_p), jnp.float32),
        grid=(n_p // block_dst,),
        in_specs=[
            pl.BlockSpec((n_p, f_in), lambda i: (0, 0)),         # x   (revisited -> DMA'd once)
            pl.BlockSpec((f_in, f_out_p), lambda i: (0, 0)),     # W
            pl.BlockSpec((1, f_out_p), lambda i: (0, 0)),        # att_src
            pl.BlockSpec((1, f_out_p), lambda i: (0, 0)),        # att_dst
            pl.BlockSpec((1, f_out_p), lambda i: (0, 0)),        # bias
            pl.BlockSpec(memory_space=pltpu.MemorySpace.SMEM),   # c_edge scalar
            pl.BlockSpec((block_dst, n_p), lambda i: (i, 0)),    # adj   (bf16, pipelined)
            pl.BlockSpec((block_dst, n_p), lambda i: (i, 0)),    # eattr (bf16, pipelined)
        ],
        out_specs=pl.BlockSpec((block_dst, f_out_p), lambda i: (i, 0)),
        scratch_shapes=[
            pltpu.VMEM((n_p, f_out_p), jnp.bfloat16),            # h (projected features)
            pltpu.VMEM((1, n_p), jnp.float32),                   # a_src per source node
            pltpu.VMEM((n_p, 1), jnp.float32),                   # a_dst per target node
        ],
        compiler_params=pltpu.CompilerParams(
            dimension_semantics=("arbitrary",),                  # scratch carries h across tiles
            vmem_limit_bytes=_VMEM_LIMIT,
        ),
    )(x, w, att_src, att_dst, bias, c_edge, adj, eattr)


def gat_dual_layer(x, params_mu, params_ls, adj, eattr, *, block_dst):
    """Fused conv_mu / conv_logstd: one pallas_call, adjacency read once, shared projection."""
    n_p, f_in = x.shape
    assert n_p % block_dst == 0 and block_dst % 8 == 0
    f_out = params_mu["w"].shape[1]
    f_out_p = _round_up(f_out, 128)

    w_cat = jnp.concatenate([_pad2(params_mu["w"].astype(jnp.float32), f_in, f_out_p),
                             _pad2(params_ls["w"].astype(jnp.float32), f_in, f_out_p)], axis=1)

    def att_mat(key):
        z = jnp.zeros((1, f_out_p), jnp.float32)
        row_mu = jnp.concatenate([_pad2(params_mu[key], 1, f_out_p), z], axis=1)
        row_ls = jnp.concatenate([z, _pad2(params_ls[key], 1, f_out_p)], axis=1)
        return jnp.concatenate([row_mu, row_ls], axis=0)         # (2, 2*f_out_p) block-diagonal

    att_src = att_mat("att_src")
    att_dst = att_mat("att_dst")
    bias = jnp.concatenate([_pad2(params_mu["bias"], 1, f_out_p),
                            _pad2(params_ls["bias"], 1, f_out_p)], axis=0)     # (2, f_out_p)
    c_edge = jnp.asarray(params_mu["c_edge"], jnp.float32).reshape(1)

    kernel = functools.partial(gat_dual_kernel, block_dst=block_dst, f_out_p=f_out_p)
    mu, ls = pl.pallas_call(
        kernel,
        out_shape=(jax.ShapeDtypeStruct((n_p, f_out_p), jnp.float32),
                   jax.ShapeDtypeStruct((n_p, f_out_p), jnp.float32)),
        grid=(n_p // block_dst,),
        in_specs=[
            pl.BlockSpec((n_p, f_in), lambda i: (0, 0)),          # x (hidden features)
            pl.BlockSpec((f_in, 2 * f_out_p), lambda i: (0, 0)),  # [W_mu | W_logstd]
            pl.BlockSpec((2, 2 * f_out_p), lambda i: (0, 0)),     # att_src (block-diag)
            pl.BlockSpec((2, 2 * f_out_p), lambda i: (0, 0)),     # att_dst (block-diag)
            pl.BlockSpec((2, f_out_p), lambda i: (0, 0)),         # bias rows
            pl.BlockSpec(memory_space=pltpu.MemorySpace.SMEM),    # c_edge (mu only)
            pl.BlockSpec((block_dst, n_p), lambda i: (i, 0)),     # adj   (bf16, pipelined)
            pl.BlockSpec((block_dst, n_p), lambda i: (i, 0)),     # eattr (bf16, pipelined)
        ],
        out_specs=(pl.BlockSpec((block_dst, f_out_p), lambda i: (i, 0)),
                   pl.BlockSpec((block_dst, f_out_p), lambda i: (i, 0))),
        scratch_shapes=[
            pltpu.VMEM((n_p, 2 * f_out_p), jnp.bfloat16),
            pltpu.VMEM((2, n_p), jnp.float32),
            pltpu.VMEM((n_p, 2), jnp.float32),
        ],
        compiler_params=pltpu.CompilerParams(
            dimension_semantics=("arbitrary",),
            vmem_limit_bytes=_VMEM_LIMIT,
        ),
    )(x, w_cat, att_src, att_dst, bias, c_edge, adj, eattr)
    return mu, ls


# ---------------- glue: parameter init + dense graph construction ----------------

def _glorot(key, shape):
    fan_in, fan_out = shape
    limit = (6.0 / (fan_in + fan_out)) ** 0.5
    return jax.random.uniform(key, shape, jnp.float32, -limit, limit)


def init_gat_params(key, f_in, f_out):
    ks = jax.random.split(key, 5)
    w = _glorot(ks[0], (f_in, f_out))
    att_src = _glorot(ks[1], (1, f_out))
    att_dst = _glorot(ks[2], (1, f_out))
    lin_edge = _glorot(ks[3], (1, f_out))   # edge_dim = 1
    att_edge = _glorot(ks[4], (1, f_out))
    bias = jnp.zeros((1, f_out), jnp.float32)
    # For scalar edge attr e: (lin_edge(e) * att_edge).sum() = e * (lin_edge . att_edge)
    c_edge = jnp.sum(lin_edge * att_edge)
    return dict(w=w, att_src=att_src, att_dst=att_dst, bias=bias, c_edge=c_edge)


def densify_graph(edge_index, edge_weights, n):
    src = edge_index[0]
    dst = edge_index[1]
    adj = jnp.zeros((n, n), jnp.float32).at[dst, src].set(1.0)
    ew = edge_weights[:, 0].astype(jnp.float32)
    eattr = jnp.zeros((n, n), jnp.float32).at[dst, src].set(ew)
    # self-loop attr = mean of incoming edge attrs (PyG fill_value='mean'); 0 if no in-edges
    sum_in = jnp.zeros((n,), jnp.float32).at[dst].add(ew)
    cnt_in = jnp.zeros((n,), jnp.float32).at[dst].add(1.0)
    self_attr = sum_in / jnp.maximum(cnt_in, 1.0)
    eattr = eattr.at[jnp.arange(n), jnp.arange(n)].set(self_attr)
    adj = adj.at[jnp.arange(n), jnp.arange(n)].set(1.0)          # add_self_loops=True
    return adj, eattr


def variational_gcn_encoder(x, edge_index, edge_weights, params, *, block_dst=256):
    n, f_in = x.shape
    assert block_dst % 8 == 0
    t = min(block_dst, _round_up(n, 8))
    n_p = _round_up(n, t)

    adj, eattr = densify_graph(edge_index, edge_weights, n)
    adj_p = _pad2(adj, n_p, n_p).astype(jnp.bfloat16)
    eattr_p = _pad2(eattr, n_p, n_p).astype(jnp.bfloat16)
    h = _pad2(x.astype(jnp.float32), n_p, f_in)

    for p in params["conv1"]:
        h = gat_layer(h, p, adj_p, eattr_p, block_dst=t, apply_relu=True)    # (n_p, H_p)

    mu_p, logstd_p = gat_dual_layer(h, params["conv_mu"], params["conv_logstd"],
                                    adj_p, eattr_p, block_dst=t)
    out_c = params["conv_mu"]["w"].shape[1]
    return mu_p[:n, :out_c], logstd_p[:n, :out_c]


if __name__ == "__main__":
    in_channels, hidden_channels, out_channels = 4, 32, 16
    num_nodes, num_edges = 16, 40

    key = jax.random.PRNGKey(0)
    k_x, k_src, k_off, k_ew, k_p1, k_pmu, k_pls = jax.random.split(key, 7)

    x = jax.random.normal(k_x, (num_nodes, in_channels), jnp.float32)

    # random edges without self-loops (edge_index[0]=src, edge_index[1]=dst)
    src = jax.random.randint(k_src, (num_edges,), 0, num_nodes)
    off = jax.random.randint(k_off, (num_edges,), 1, num_nodes)
    dst = (src + off) % num_nodes
    edge_index = jnp.stack([src, dst]).astype(jnp.int32)                       # (2, E)
    edge_weights = jax.random.uniform(k_ew, (num_edges, 1), jnp.float32)       # edge_dim = 1

    params = {
        "conv1": [init_gat_params(k_p1, in_channels, hidden_channels)],        # num_layers=1
        "conv_mu": init_gat_params(k_pmu, hidden_channels, out_channels),
        "conv_logstd": init_gat_params(k_pls, hidden_channels, out_channels),
    }

    # block_dst=8 so the toy graph (N=16) still exercises a multi-step pipelined grid.
    mu, logstd = variational_gcn_encoder(x, edge_index, edge_weights, params, block_dst=8)
    jax.block_until_ready((mu, logstd))
    assert mu.shape == (num_nodes, out_channels)
    assert logstd.shape == (num_nodes, out_channels)
    print("KERNEL_OK")
</pallas_src>

<mosaic_0001>
module attributes {stable_mosaic.version = 11 : i64} {
  func.func @gat_layer_kernel(%arg0: i32, %arg1: memref<16x4xf32, #tpu.memory_space<vmem>>, %arg2: memref<4x128xf32, #tpu.memory_space<vmem>>, %arg3: memref<1x128xf32, #tpu.memory_space<vmem>>, %arg4: memref<1x128xf32, #tpu.memory_space<vmem>>, %arg5: memref<1x128xf32, #tpu.memory_space<vmem>>, %arg6: memref<1xf32, #tpu.memory_space<smem>>, %arg7: memref<8x16xbf16, #tpu.memory_space<vmem>>, %arg8: memref<8x16xbf16, #tpu.memory_space<vmem>>, %arg9: memref<8x128xf32, #tpu.memory_space<vmem>>, %arg10: memref<16x128xbf16, #tpu.memory_space<vmem>>, %arg11: memref<1x16xf32, #tpu.memory_space<vmem>>, %arg12: memref<16x1xf32, #tpu.memory_space<vmem>>) attributes {dimension_semantics = [#tpu.dimension_semantics<arbitrary>], iteration_bounds = array<i64: 2>, scalar_prefetch = 0 : i64, scratch_operands = 3 : i64, tpu.core_type = #tpu.core_type<tc>, window_params = [{pipeline_mode = #tpu.pipeline_mode<synchronous>, transform_indices = @transform_0, window_bounds = array<i64: 16, 4>}, {pipeline_mode = #tpu.pipeline_mode<synchronous>, transform_indices = @transform_1, window_bounds = array<i64: 4, 128>}, {pipeline_mode = #tpu.pipeline_mode<synchronous>, transform_indices = @transform_2, window_bounds = array<i64: 1, 128>}, {pipeline_mode = #tpu.pipeline_mode<synchronous>, transform_indices = @transform_3, window_bounds = array<i64: 1, 128>}, {pipeline_mode = #tpu.pipeline_mode<synchronous>, transform_indices = @transform_4, window_bounds = array<i64: 1, 128>}, {transform_indices = @transform_5, window_bounds = array<i64: 1>}, {transform_indices = @transform_6, window_bounds = array<i64: 8, 16>}, {transform_indices = @transform_7, window_bounds = array<i64: 8, 16>}, {transform_indices = @transform_8, window_bounds = array<i64: 8, 128>}]} {
    %c0_i32 = arith.constant 0 : i32
    %0 = arith.cmpi eq, %arg0, %c0_i32 : i32
    %1 = arith.extui %0 : i1 to i32
    %c0_i32_0 = arith.constant 0 : i32
    %2 = arith.cmpi ne, %1, %c0_i32_0 : i32
    scf.if %2 {
      %c0_21 = arith.constant 0 : index
      %c0_22 = arith.constant 0 : index
      %46 = vector.load %arg1[%c0_21, %c0_22] : memref<16x4xf32, #tpu.memory_space<vmem>>, vector<16x4xf32>
      %c0_23 = arith.constant 0 : index
      %c0_24 = arith.constant 0 : index
      %47 = vector.load %arg2[%c0_23, %c0_24] : memref<4x128xf32, #tpu.memory_space<vmem>>, vector<4x128xf32>
      %cst_25 = arith.constant dense<0.000000e+00> : vector<16x128xf32>
      %48 = tpu.matmul %46, %47, %cst_25 {dimension_numbers = #tpu.dot_dimension_numbers<[1], [0], [0], [1], [0, 0, 1, 1], [], []>} : vector<16x4xf32>, vector<4x128xf32>, vector<16x128xf32> -> vector<16x128xf32>
      %49 = arith.truncf %48 : vector<16x128xf32> to vector<16x128xbf16>
      %c0_26 = arith.constant 0 : index
      %c0_27 = arith.constant 0 : index
      %50 = vector.load %arg10[%c0_26, %c0_27] : memref<16x128xbf16, #tpu.memory_space<vmem>>, vector<16x128xbf16>
      tpu.vector_store %arg10[%c0_26, %c0_27], %49 {strides = array<i32>} : memref<16x128xbf16, #tpu.memory_space<vmem>>, vector<16x128xbf16>,
      %c0_28 = arith.constant 0 : index
      %c0_29 = arith.constant 0 : index
      %51 = vector.load %arg3[%c0_28, %c0_29] : memref<1x128xf32, #tpu.memory_space<vmem>>, vector<1x128xf32>
      %cst_30 = arith.constant dense<0.000000e+00> : vector<1x16xf32>
      %52 = tpu.matmul %51, %48, %cst_30 {dimension_numbers = #tpu.dot_dimension_numbers<[1], [1], [0], [0], [0, 0, 1, 0], [], []>} : vector<1x128xf32>, vector<16x128xf32>, vector<1x16xf32> -> vector<1x16xf32>
      %c0_31 = arith.constant 0 : index
      %c0_32 = arith.constant 0 : index
      %53 = vector.load %arg11[%c0_31, %c0_32] : memref<1x16xf32, #tpu.memory_space<vmem>>, vector<1x16xf32>
      tpu.vector_store %arg11[%c0_31, %c0_32], %52 {strides = array<i32>} : memref<1x16xf32, #tpu.memory_space<vmem>>, vector<1x16xf32>,
      %c0_33 = arith.constant 0 : index
      %c0_34 = arith.constant 0 : index
      %54 = vector.load %arg4[%c0_33, %c0_34] : memref<1x128xf32, #tpu.memory_space<vmem>>, vector<1x128xf32>
      %cst_35 = arith.constant dense<0.000000e+00> : vector<16x1xf32>
      %55 = tpu.matmul %48, %54, %cst_35 {dimension_numbers = #tpu.dot_dimension_numbers<[1], [1], [0], [0], [0, 0, 1, 0], [], []>} : vector<16x128xf32>, vector<1x128xf32>, vector<16x1xf32> -> vector<16x1xf32>
      %c0_36 = arith.constant 0 : index
      %c0_37 = arith.constant 0 : index
      %56 = vector.load %arg12[%c0_36, %c0_37] : memref<16x1xf32, #tpu.memory_space<vmem>>, vector<16x1xf32>
      tpu.vector_store %arg12[%c0_36, %c0_37], %55 {strides = array<i32>} : memref<16x1xf32, #tpu.memory_space<vmem>>, vector<16x1xf32>,
    } else {
    }
    %c8_i32 = arith.constant 8 : i32
    %3 = arith.muli %arg0, %c8_i32 : i32
    %4 = tpu.assume_multiple %3, 8 : i32
    %5 = arith.index_cast %4 : i32 to index
    %c0 = arith.constant 0 : index
    %6 = vector.load %arg12[%5, %c0] : memref<16x1xf32, #tpu.memory_space<vmem>>, vector<8x1xf32>
    %c0_1 = arith.constant 0 : index
    %c0_2 = arith.constant 0 : index
    %7 = vector.load %arg11[%c0_1, %c0_2] : memref<1x16xf32, #tpu.memory_space<vmem>>, vector<1x16xf32>
    %c0_3 = arith.constant 0 : index
    %8 = memref.load %arg6[%c0_3] : memref<1xf32, #tpu.memory_space<smem>>
    %9 = vector.broadcast %6 : vector<8x1xf32> to vector<8x16xf32>
    %10 = vector.broadcast %7 : vector<1x16xf32> to vector<8x16xf32>
    %11 = arith.addf %9, %10 : vector<8x16xf32>
    %c0_4 = arith.constant 0 : index
    %c0_5 = arith.constant 0 : index
    %12 = vector.load %arg8[%c0_4, %c0_5] : memref<8x16xbf16, #tpu.memory_space<vmem>>, vector<8x16xbf16>
    %13 = arith.extf %12 : vector<8x16xbf16> to vector<8x16xf32>
    %14 = vector.broadcast %8 : f32 to vector<8x16xf32>
    %15 = arith.mulf %14, %13 : vector<8x16xf32>
    %16 = arith.addf %11, %15 : vector<8x16xf32>
    %cst = arith.constant 0.000000e+00 : f32
    %17 = vector.broadcast %cst : f32 to vector<8x16xf32>
    %18 = arith.cmpf oge, %16, %17 : vector<8x16xf32>
    %cst_6 = arith.constant 2.000000e-01 : f32
    %19 = vector.broadcast %cst_6 : f32 to vector<8x16xf32>
    %20 = arith.mulf %19, %16 : vector<8x16xf32>
    %21 = arith.select %18, %16, %20 : vector<8x16xi1>, vector<8x16xf32>
    %c0_7 = arith.constant 0 : index
    %c0_8 = arith.constant 0 : index
    %22 = vector.load %arg7[%c0_7, %c0_8] : memref<8x16xbf16, #tpu.memory_space<vmem>>, vector<8x16xbf16>
    %cst_9 = arith.constant 0.000000e+00 : bf16
    %23 = vector.broadcast %cst_9 : bf16 to vector<8x16xbf16>
    %24 = arith.cmpf ogt, %22, %23 : vector<8x16xbf16>
    %cst_10 = arith.constant -1.000000e+30 : f32
    %25 = vector.broadcast %cst_10 : f32 to vector<8x16xf32>
    %26 = arith.select %24, %21, %25 : vector<8x16xi1>, vector<8x16xf32>
    %cst_11 = arith.constant dense<0xFF800000> : vector<8xf32>
    %27 = vector.multi_reduction <maximumf>, %26, %cst_11 [1] : vector<8x16xf32> to vector<8xf32>
    %28 = vector.shape_cast %27 : vector<8xf32> to vector<8x1xf32>
    %29 = vector.broadcast %28 : vector<8x1xf32> to vector<8x16xf32>
    %30 = arith.subf %26, %29 : vector<8x16xf32>
    %31 = math.exp %30 : vector<8x16xf32>
    %cst_12 = arith.constant dense<0.000000e+00> : vector<8xf32>
    %32 = vector.multi_reduction <add>, %31, %cst_12 [1] : vector<8x16xf32> to vector<8xf32>
    %33 = vector.shape_cast %32 : vector<8xf32> to vector<8x1xf32>
    %34 = tpu.reciprocal %33 {approx = true} : vector<8x1xf32> -> vector<8x1xf32>
    %35 = arith.truncf %31 : vector<8x16xf32> to vector<8x16xbf16>
    %c0_13 = arith.constant 0 : index
    %c0_14 = arith.constant 0 : index
    %36 = vector.load %arg10[%c0_13, %c0_14] : memref<16x128xbf16, #tpu.memory_space<vmem>>, vector<16x128xbf16>
    %cst_15 = arith.constant dense<0.000000e+00> : vector<8x128xf32>
    %37 = tpu.matmul %35, %36, %cst_15 {dimension_numbers = #tpu.dot_dimension_numbers<[1], [0], [0], [1], [0, 0, 1, 1], [], []>} : vector<8x16xbf16>, vector<16x128xbf16>, vector<8x128xf32> -> vector<8x128xf32>
    %38 = vector.broadcast %34 : vector<8x1xf32> to vector<8x128xf32>
    %39 = arith.mulf %37, %38 : vector<8x128xf32>
    %c0_16 = arith.constant 0 : index
    %c0_17 = arith.constant 0 : index
    %40 = vector.load %arg5[%c0_16, %c0_17] : memref<1x128xf32, #tpu.memory_space<vmem>>, vector<1x128xf32>
    %41 = vector.broadcast %40 : vector<1x128xf32> to vector<8x128xf32>
    %42 = arith.addf %39, %41 : vector<8x128xf32>
    %cst_18 = arith.constant 0.000000e+00 : f32
    %43 = vector.broadcast %cst_18 : f32 to vector<8x128xf32>
    %44 = arith.maximumf %42, %43 : vector<8x128xf32>
    %c0_19 = arith.constant 0 : index
    %c0_20 = arith.constant 0 : index
    %45 = vector.load %arg9[%c0_19, %c0_20] : memref<8x128xf32, #tpu.memory_space<vmem>>, vector<8x128xf32>
    tpu.vector_store %arg9[%c0_19, %c0_20], %44 {strides = array<i32>} : memref<8x128xf32, #tpu.memory_space<vmem>>, vector<8x128xf32>,
    return
  }
  func.func @transform_0(%arg0: i32) -> (i32, i32) {
    %c0_i32 = arith.constant 0 : i32
    %c0_i32_0 = arith.constant 0 : i32
    %c0_i32_1 = arith.constant 0 : i32
    return %c0_i32, %c0_i32_0 : i32, i32
  }
  func.func @transform_1(%arg0: i32) -> (i32, i32) {
    %c0_i32 = arith.constant 0 : i32
    %c0_i32_0 = arith.constant 0 : i32
    %c0_i32_1 = arith.constant 0 : i32
    return %c0_i32, %c0_i32_0 : i32, i32
  }
  func.func @transform_2(%arg0: i32) -> (i32, i32) {
    %c0_i32 = arith.constant 0 : i32
    %c0_i32_0 = arith.constant 0 : i32
    %c0_i32_1 = arith.constant 0 : i32
    return %c0_i32, %c0_i32_0 : i32, i32
  }
  func.func @transform_3(%arg0: i32) -> (i32, i32) {
    %c0_i32 = arith.constant 0 : i32
    %c0_i32_0 = arith.constant 0 : i32
    %c0_i32_1 = arith.constant 0 : i32
    return %c0_i32, %c0_i32_0 : i32, i32
  }
  func.func @transform_4(%arg0: i32) -> (i32, i32) {
    %c0_i32 = arith.constant 0 : i32
    %c0_i32_0 = arith.constant 0 : i32
    %c0_i32_1 = arith.constant 0 : i32
    return %c0_i32, %c0_i32_0 : i32, i32
  }
  func.func @transform_5(%arg0: i32) -> i32 {
    %c0_i32 = arith.constant 0 : i32
    %c0_i32_0 = arith.constant 0 : i32
    return %c0_i32 : i32
  }
  func.func @transform_6(%arg0: i32) -> (i32, i32) {
    %c0_i32 = arith.constant 0 : i32
    %c0_i32_0 = arith.constant 0 : i32
    return %arg0, %c0_i32 : i32, i32
  }
  func.func @transform_7(%arg0: i32) -> (i32, i32) {
    %c0_i32 = arith.constant 0 : i32
    %c0_i32_0 = arith.constant 0 : i32
    return %arg0, %c0_i32 : i32, i32
  }
  func.func @transform_8(%arg0: i32) -> (i32, i32) {
    %c0_i32 = arith.constant 0 : i32
    %c0_i32_0 = arith.constant 0 : i32
    return %arg0, %c0_i32 : i32, i32
  }
}

</mosaic_0001>

<bundles_post_ra>
// kernel: tpu_custom_call.1
= control target key start
LH: loop header
LB: loop body
LE: loop exit
PB: predicated region body
PF: predicated region fallthrough
CT: control target
= control target key end

     0   :  { %s877_s0 = inlined_call_operand.vmem [shape: f32[16,4], index: 0, kind: input, shape index: {}]   ;;  %s878_s1 = inlined_call_operand.vmem [shape: f32[4,128], index: 1, kind: input, shape index: {}]   ;;  %s879_s2 = inlined_call_operand.vmem [shape: f32[1,128], index: 2, kind: input, shape index: {}]   ;;  %s880_s3 = inlined_call_operand.vmem [shape: f32[1,128], index: 3, kind: input, shape index: {}]   ;;  %s881_s4 = inlined_call_operand.vmem [shape: f32[1,128], index: 4, kind: input, shape index: {}]   ;;  %s882_s5 = inlined_call_operand.<no memory space> [shape: f32[1], index: 5, kind: input, shape index: {}]   ;;  %s883_s6 = inlined_call_operand.vmem [shape: bf16[16,16], index: 6, kind: input, shape index: {}]   ;;  %s884_s7 = inlined_call_operand.vmem [shape: bf16[16,16], index: 7, kind: input, shape index: {}]   ;;  %s885_s8 = inlined_call_operand.hbm [shape: f32[16,128], index: 8, kind: output, shape index: {}]  }
   0x1   :  { %13 = sst [smem:[#allocation5]] %s882_s5 }
   0x2   :  { %14 = vsyncpa [#allocation7], 0 }
   0x3   :  { %16 = vsyncpa [#allocation7 + $0x1], 0  ;;  %s749_s29 = smov 0   ;;  %s751_s30 = smov 0  }
   0x4   :  { %s753_s9 = smov 0   ;;  %s755_s10 = smov 0  }
   0x5 LB: > { %s770_s5 = sadd.s32 4294967295, %s698_s10   ;;  %s560_s11 = sadd.s32 4294967294, %s698_s10   ;;  %s698_s10 = sphi %s755_s10, %s891_s10   ;;  %s694_s9 = sphi %s753_s9, %s890_s9   ;;  %s690_s30 = sphi %s751_s30, %s889_s30   ;;  %s686_s29 = sphi %s749_s29, %s888_s29  }
   0x6   : > { %s774_s12 = sadd.s32 1, %s698_s10   ;;  %s207_s13 = sadd.s32 1, %s694_s9 }
   0x7   : > { %s204_s14 = ssub.s32 %s698_s10, %s774_s12  ;;  %p217_p0 = scmp.ne.s32.totalorder %s694_s9, %s690_s30 }
   0x8   : > { %p205_p1 = scmp.eq.s32.totalorder %s204_s14, 0  ;;  %p218_p2 = scmp.eq.s32.totalorder %s770_s5, 1 }
   0x9   : > { %p223_p3 = scmp.ne.s32.totalorder %s690_s30, %s686_s29  ;;  %p224_p4 = scmp.eq.s32.totalorder %s560_s11, 1 }
   0xa   : > { %s785_s15 = scalar_select %p205_p1, %s694_s9, %s207_s13  }
   0xb   : > { %p787_p5 = por %p218_p2, %p217_p0  ;;  %p791_p6 = por %p224_p4, %p223_p3 }
   0xc   : > { %p563_p7 = scmp.ge.s32.totalorder %s698_s10, 1  ;;  %p274_p8 = scmp.lt.s32.totalorder %s698_s10, 3 }
   0xe   : > { %p275_p9 = pnand %p563_p7, %p274_p8 }
   0xf   : > { %s308_s18 = sand.u32 (!%p275_p9), 1, %s690_s30   ;;  %p311_p10 = scmp.lt.s32.totalorder (!%p275_p9), %s770_s5, 1 }
  0x10   : > { %278 = sbr.rel (%p275_p9) target bundleno = 687 (0x2af), region = 52  ;;  %s801_s19 = sshll.u32 (!%p275_p9), %s308_s18, 3 }
  0x11   : > { %s310_s28 = scalar_lea.vmem (!%p275_p9), [#allocation6], %s801_s19  ;;  %p567_p11 = scmp.ne.s32.totalorder (!%p275_p9), %s770_s5, 0 }
  0x15   : > { %s312_s20 = scalar_select %p311_p10, %s770_s5, 1 }
  0x16   : > { %323 = sbr.rel (%p567_p11) target bundleno = 295 (0x127), region = 56 }
  0x17   : > { %s565_s21 = sshll.u32 %s312_s20, 2 }
  0x18   : > { %s807_s24 = scalar_lea.vmem %s883_s6, %s565_s21  ;;  %s812_s27 = scalar_lea.vmem %s884_s7, %s565_s21 }
  0x1b   : > { %v326_v0 = vld [vmem:[%s878_s1] sm:$0xf]  ;;  %vm334_vm0 = vcmask 1043456   ;;  %vm327_vm1 = vcmask 31744   ;;  %v325_v2 = vld [vmem:[%s877_s0 + $0x8] sm:$0xff]  ;;  %vm398_vm2 = vcmask 7168  }
  0x1c   : > { %v324_v1 = vld [vmem:[%s877_s0] sm:$0xff]  ;;  %568 = vmatpush.msk.msra.mxu0 %vm334_vm0, %v326_v0  ;;  %587 = vmatpush.msk.msra.mxu2 %vm334_vm0, %v326_v0  ;;  %vm386_vm3 = vcmask 122880  }
  0x1d   : > { %569 = vmatmul.msk.f32.vlgmr.msra.gmra.mxu0 %vm327_vm1, %v324_v1  ;;  %570 = vmatmul.msk.f32.vlgmr.msra.gmra.mxu2 %vm327_vm1, %v325_v2  ;;  %v628_v3 = vld [vmem:[%s880_s3] ss:$0 sm:$0xff] }
  0x1e   : > { %v365_v9 = vld [vmem:[%s879_s2] sm:$0x1] }
  0x9a   : > { %v355_v4 = vpop.f32.mrf.mxu0 }
  0x9b   : > { %v392_v5 = vmul.f32 %v628_v3, %v355_v4 }
  0x9d   : > { %394 = vadd.xlane.f32.xlu0 %v392_v5 }
  0xa0   : > { %v358_v6 = vpop.f32.mrf.mxu2 }
  0xa1   : > { %v585_v7 = vpack.c.bf16 %v358_v6, %v355_v4  ;;  %380 = vmatpush.xpose.msra.mxu1 %v358_v6  ;;  %v393_v8 = vmul.f32 %v628_v3, %v358_v6 }
  0xa3   : > { %586 = vst [vmem:[#allocation2] sm:$0xff] %v585_v7  }
  0xa5   : > { %396 = vadd.xlane.f32.xlu0 %v393_v8  ;;  %381 = vmatpush.xpose.msra.mxu1 %v355_v4 }
  0xa8   : > { %382 = vmatmul.f32.vlgmr.msra.gmra.mxu1 %v365_v9 }
 0x110   : > { %v395_v10 = vpop.xlane.xlu0 %394 }
 0x111   : > { %399 = vst.msk [vmem:[#allocation4] sm:$0xff] %vm398_vm2, %v395_v10 }
 0x118   : > { %v397_v11 = vpop.xlane.xlu0 %396 }
 0x119   : > { %400 = vst.msk [vmem:[#allocation4 + $0x8] sm:$0xff] %vm398_vm2, %v397_v11 }
 0x125   : > { %v383_v12 = vpop.f32.mrf.mxu1 }
 0x126   : > { %387 = vst.msk [vmem:[#allocation3] sm:$0x1] %vm386_vm3, %v383_v12 }
 0x127 PF: > { %s571_s13 = sshll.u32 %s770_s5, 3  ;;  %v700_v13 = vmov 0   ;;  %s405_s20 = sld [smem:[#allocation5]]  ;;  %v415_v15 = vld [vmem:[%s812_s27] sm:$0xf]  ;;  %vm427_vm6 = vcmask 130048  }
 0x128   : > { %629 = vset.pattern.permute.xlu0 %v700_v13  ;;  %s402_s14 = scalar_lea.vmem [#allocation4], %s571_s13  ;;  %v416_v16 = vunpack.c.l.bf16 %v415_v15  ;;  %v423_v19 = vld [vmem:[%s807_s24] sm:$0xf]  ;;  %s482_s22 = scalar_lea.hbm %s885_s8, %s571_s13 }
 0x129   : > { %v403_v14 = vld [vmem:[%s402_s14] sm:$0xff]  ;;  %v424_v23 = vunpack.c.l.bf16 %v423_v19  ;;  %s486_s25 = sshll.u32 %s482_s22, 4  ;;  %s484_s26 = sshll.u32 %s310_s28, 4  ;;  %s487_s25 = int_to_ptr.hbm [resolvable:$true] %s486_s25  ;;  %s485_s26 = int_to_ptr.vmem [resolvable:$true] %s484_s26 }
 0x12a   : > { %408 = vperm.xlu0 %629, %v403_v14   ;;  %v581_v29 = vld [vmem:[#allocation2] sm:$0xff]  ;;  %s472_s5 = scalar_lea.sflag [#allocation7], %s308_s18  ;;  %s650_s11 = sshra.s32 %s487_s25, 4  ;;  %s651_s11 = int_to_ptr.hbm [resolvable:$true] %s650_s11 }
 0x12b   : > { %vm425_vm5 = vcmp.gt.f32.partialorder %v424_v23, 0.0  ;;  %457 = vmatpush.bf16.msra.mxu0 %v581_v29  ;;  %v631_v37 = vld [vmem:[%s881_s4] ss:$0 sm:$0xff]  ;;  %s652_s13 = scalar_lea.hbm %s651_s11, 8  ;;  %s656_s24 = scalar_lea.hbm %s885_s8, 16 }
 0x12c   : > { %p653_p12 = scmp.ne.s32.totalorder %s651_s11, %s652_s13  ;;  %p657_p1 = scmp.lt.s32.totalorder %s651_s11, %s885_s8 }
 0x12d   : > { %v417_v17 = vstv %s405_s20  ;;  %v630_v18 = vld [vmem:[#allocation3] ss:$0 sm:$0xff]  ;;  %p658_p2 = scmp.lt.s32.totalorder %s656_s24, %s652_s13 }
 0x12e   : > { %v418_v20 = vmul.f32 %v417_v17, %v416_v16  ;;  %p654_p13 = pnand %p653_p12, %p787_p5 }
 0x12f   : > { %p659_p3 = por %p658_p2, %p657_p1 }
 0x130   : > { %p655_p0 = pneg %p654_p13 }
 0x132   : > { %p660_p4 = pnand %p659_p3, %p655_p0 }
 0x19c   : > { %v409_v21 = vpop.permute.xlu0 %408 }
 0x19d   : > { %v414_v22 = vadd.f32 %v630_v18, %v409_v21 }
 0x19f   : > { %v419_v24 = vadd.f32 %v418_v20, %v414_v22 }
 0x1a1   : > { %vm420_vm4 = vcmp.ge.f32.partialorder %v419_v24, 0.0  ;;  %v421_v25 = vmul.f32 0.2, %v419_v24 }
 0x1a3   : > { %v422_v26 = vsel %vm420_vm4, %v419_v24, %v421_v25 }
 0x1a4   : > { %v426_v27 = vsel %vm425_vm5, %v422_v26, -1e+30 }
 0x1a5   : > { %v428_v28 = vsel %vm427_vm6, %v426_v27, -inf }
 0x1a6   : > { %429 = vmax.xlane.f32.xlu0 %v428_v28 }
 0x219   : > { %v430_v30 = vpop.xlane.xlu0 %429 }
 0x21a   : > { %v431_v31 = vsub.f32 %v426_v27, %v430_v30 }
 0x21c   : > { %v432_v32 = vmul.f32 1.442695, %v431_v31 }
 0x21e   : > { %632 = vpow2.f32 %v432_v32 }
 0x224   : > { %v633_v33 = vpop.eup %632 }
 0x225   : > { %v434_v34 = vsel %vm427_vm6, %v633_v33, 0.0  ;;  %v438_v35 = vpack.c.bf16 %v633_v33, %v633_v33 }
 0x226   : > { %435 = vadd.xlane.f32.xlu1 %v434_v34 }
 0x227   : > { %576 = vmatmul.msk.bf16.vlgmr.msra.gmra.mxu0 %vm427_vm6, %v438_v35 }
 0x299   : > { %v436_v36 = vpop.xlane.xlu1 %435 }
 0x29a   : > { %634 = vrcp.f32 %v436_v36 }
 0x2a0   : > { %v635_v38 = vpop.eup %634 }
 0x2a4   : > { %v459_v39 = vpop.f32.mrf.mxu0 }
 0x2a5   : > { %v463_v40 = vmul.f32 %v635_v38, %v459_v39 }
 0x2a7   : > { %v468_v41 = vadd.f32 %v631_v37, %v463_v40 }
 0x2a9   : > { %v469_v42 = vmax.f32 %v468_v41, 0.0 }
 0x2ab   : > { %470 = vst [vmem:[%s310_s28] sm:$0xff] %v469_v42 }
 0x2ac   : > { %v461_v43 = vpop.f32.mrf.mxu0 }
 0x2ad   : > { %663 = shalt.err (!%p660_p4)
}
 0x2ae   : > { %588 = dma.vmem_to_hbm [thread:$0]  (%p787_p5), %s485_s26, 128, %s487_s25, %s472_s5  }
 0x2af PF: > { %p594_p7 = scmp.ge.s32.totalorder %s698_s10, 2  ;;  %s498_s18 = sand.u32 1, %s686_s29  }
 0x2b0   : > { %s499_s19 = scalar_lea.sflag [#allocation7], %s498_s18 }
 0x2b1   : > { %p591_p8 = pnand %p594_p7, %p791_p6 }
 0x2b3   : > { %p592_p9 = pneg %p591_p8 }
 0x2b5   : > { %681 = dma.done.wait (%p592_p9), %s499_s19, 128  }
 0x2b6   : > { %683 = vsyncadd (%p592_p9), %s499_s19, 4294967168  ;;  %p19_p10 = scmp.ge.s32.totalorder %s774_s12, 4   ;;  %s888_s29 = smov %s690_s30 }
 0x2b7   : > { %s889_s30 = smov %s694_s9  ;;  %s890_s9 = smov %s785_s15 }
 0x2b8   : > { %s891_s10 = smov %s774_s12  ;;  %21 = sbr.rel (!%p19_p10) target bundleno = 5 (0x5), region = 95 }
 0x2bd   :  { %505 = vsyncpa [#allocation7], 1 }
 0x2be   :  { %507 = vsyncpa [#allocation7 + $0x1], 1 }

</bundles_post_ra>
